<compile_context>
chip_gen: v6e
topology: v6e:2x2x1
jax: 0.10.0
libtpu: 0.0.40
codegen_flags: <defaults>
</compile_context>

<pallas_src>
import math
import jax
import jax.numpy as jnp
from jax.experimental import pallas as pl
from jax.experimental.pallas import tpu as pltpu


# ----------------------------------------------------------------------------
# Kernel: out_tile = concat([x_tile, pe_tile], axis=-1)   (lane-axis concat)
# ----------------------------------------------------------------------------
def _pos_enc_concat_kernel(x_ref, pe_ref, o_ref):
    x = x_ref[...].astype(o_ref.dtype)
    pe = pe_ref[...].astype(o_ref.dtype)   # bf16 pe -> output dtype (exact upcast)
    d = x.shape[-1]
    if d % 128 == 0:
        # Two lane-aligned, unmasked stores; avoids the concat's lane shuffles.
        o_ref[:, :d] = x
        o_ref[:, d:] = pe
    else:
        # d < 128 (or not lane-aligned): a single lane-dense store of the
        # concatenated tile beats two masked partial-lane stores.
        o_ref[...] = jnp.concatenate([x, pe], axis=-1)


# ----------------------------------------------------------------------------
# Tile-size selection: size by bytes, guard VMEM, respect sublane packing.
# ----------------------------------------------------------------------------
def _sublane_multiple(dtype) -> int:
    bits = jnp.dtype(dtype).itemsize * 8
    return max(8, 256 // bits)          # 8 for 32-bit, 16 for 16-bit, 32 for 8-bit


def _choose_tile_rows(s, d, x_dtype, pe_dtype, out_dtype,
                      target_step_bytes=4 << 20,      # ~4 MiB moved per grid step
                      vmem_budget_bytes=24 << 20):    # double-buffered footprint cap
    mult = max(_sublane_multiple(x_dtype),
               _sublane_multiple(pe_dtype),
               _sublane_multiple(out_dtype))
    row_bytes = (d * jnp.dtype(x_dtype).itemsize
                 + d * jnp.dtype(pe_dtype).itemsize
                 + 2 * d * jnp.dtype(out_dtype).itemsize)
    tr_bytes = max(mult, (target_step_bytes // row_bytes) // mult * mult)
    tr_vmem = max(mult, (vmem_budget_bytes // (2 * row_bytes)) // mult * mult)
    tr = min(tr_bytes, tr_vmem)
    # Never allocate a tile larger than the (sublane-padded) sequence itself.
    s_pad = ((s + mult - 1) // mult) * mult
    return max(mult, min(tr, s_pad))


# ----------------------------------------------------------------------------
# Forward wrapper
# ----------------------------------------------------------------------------
def positional_encoding_forward(x, pe2d, *, out_dtype=None,
                                target_step_bytes=4 << 20):
    """x: (seq_len, 1, d_model); pe2d: (max_len, d_model) init-time buffer."""
    s, b, d = x.shape
    assert b == 1, "pe has batch dim 1, so torch.cat requires batch_size == 1"
    max_len, d_pe = pe2d.shape
    assert max_len >= s and d_pe == d
    out_dtype = out_dtype if out_dtype is not None else x.dtype

    x2 = x.reshape(s, d)                 # free reshape (batch dim is 1)

    tr = _choose_tile_rows(s, d, x2.dtype, pe2d.dtype, out_dtype,
                           target_step_bytes=target_step_bytes)
    grid = (pl.cdiv(s, tr),)             # only rows [0, s) of pe are streamed

    out2 = pl.pallas_call(
        _pos_enc_concat_kernel,
        out_shape=jax.ShapeDtypeStruct((s, 2 * d), out_dtype),
        grid=grid,
        in_specs=[pl.BlockSpec((tr, d), lambda i: (i, 0)),        # x rows
                  pl.BlockSpec((tr, d), lambda i: (i, 0))],       # pe rows [0, s)
        out_specs=pl.BlockSpec((tr, 2 * d), lambda i: (i, 0)),
        compiler_params=pltpu.CompilerParams(
            dimension_semantics=("parallel",)),  # v7x: shard seq tiles over 2 TCs
    )(x2, pe2d)
    return out2.reshape(s, 1, 2 * d)


# ----------------------------------------------------------------------------
# Init-time buffer (mirrors register_buffer('pe', ...); stored 2-D, bf16)
# ----------------------------------------------------------------------------
def make_pe_buffer(d_model: int, max_len: int = 5000, dtype=jnp.bfloat16):
    position = jnp.arange(max_len, dtype=jnp.float32)[:, None]            # (L, 1)
    div_term = jnp.exp(jnp.arange(0, d_model, 2, dtype=jnp.float32)
                       * (-math.log(10000.0) / d_model))                  # (D/2,)
    ang = position * div_term                                             # (L, D/2)
    pe = jnp.zeros((max_len, d_model), jnp.float32)
    pe = pe.at[:, 0::2].set(jnp.sin(ang))
    pe = pe.at[:, 1::2].set(jnp.cos(ang))
    return pe.astype(dtype)            # sin/cos in [-1,1]: bf16 halves pe read bytes


# ----------------------------------------------------------------------------
if __name__ == "__main__":
    D_MODEL = 64                          # 2*D_MODEL = 128 -> lane-dense output
    key = jax.random.PRNGKey(0)
    pe = make_pe_buffer(D_MODEL)          # (5000, 64) bf16, built once at "init"

    def reference(x):
        s = x.shape[0]
        return jnp.concatenate(
            [x, pe[:s].astype(x.dtype)[:, None, :]], axis=2)

    ok = True

    # 1) Aligned sequence, single byte-sized tile.
    SEQ = 384
    x = jax.random.normal(key, (SEQ, 1, D_MODEL), dtype=jnp.float32)
    out = jax.block_until_ready(positional_encoding_forward(x, pe))
    ok &= out.shape == (SEQ, 1, 2 * D_MODEL)
    ok &= bool(jnp.all(jnp.isfinite(out)))
    ok &= bool(jnp.allclose(out, reference(x), rtol=1e-6, atol=1e-6))

    # 2) Ragged sequence (not a multiple of the sublane packing).
    SEQ_R = 100
    x_r = jax.random.normal(jax.random.PRNGKey(1), (SEQ_R, 1, D_MODEL),
                            dtype=jnp.float32)
    out_r = jax.block_until_ready(positional_encoding_forward(x_r, pe))
    ok &= out_r.shape == (SEQ_R, 1, 2 * D_MODEL)
    ok &= bool(jnp.allclose(out_r, reference(x_r), rtol=1e-6, atol=1e-6))

    # 3) Force a multi-tile grid (small per-step byte target) to exercise the
    #    index_map streaming of later x / pe blocks.
    out_m = jax.block_until_ready(
        positional_encoding_forward(x, pe, target_step_bytes=64 * 1024))
    ok &= bool(jnp.allclose(out_m, reference(x), rtol=1e-6, atol=1e-6))

    if ok:
        print("KERNEL_OK")
</pallas_src>

<mosaic_0001>
module attributes {stable_mosaic.version = 11 : i64} {
  func.func @_pos_enc_concat_kernel(%arg0: i32, %arg1: memref<384x64xf32, #tpu.memory_space<vmem>>, %arg2: memref<384x64xbf16, #tpu.memory_space<vmem>>, %arg3: memref<384x128xf32, #tpu.memory_space<vmem>>) attributes {dimension_semantics = [#tpu.dimension_semantics<parallel>], iteration_bounds = array<i64: 1>, scalar_prefetch = 0 : i64, scratch_operands = 0 : i64, tpu.core_type = #tpu.core_type<tc>, window_params = [{transform_indices = @transform_0, window_bounds = array<i64: 384, 64>}, {transform_indices = @transform_1, window_bounds = array<i64: 384, 64>}, {transform_indices = @transform_2, window_bounds = array<i64: 384, 128>}]} {
    %c0 = arith.constant 0 : index
    %c0_0 = arith.constant 0 : index
    %0 = vector.load %arg1[%c0, %c0_0] : memref<384x64xf32, #tpu.memory_space<vmem>>, vector<384x64xf32>
    %c0_1 = arith.constant 0 : index
    %c0_2 = arith.constant 0 : index
    %1 = vector.load %arg2[%c0_1, %c0_2] : memref<384x64xbf16, #tpu.memory_space<vmem>>, vector<384x64xbf16>
    %2 = arith.extf %1 : vector<384x64xbf16> to vector<384x64xf32>
    %3 = tpu.concatenate %0, %2 in 1 : vector<384x64xf32>, vector<384x64xf32> -> vector<384x128xf32>
    %c0_3 = arith.constant 0 : index
    %c0_4 = arith.constant 0 : index
    %4 = vector.load %arg3[%c0_3, %c0_4] : memref<384x128xf32, #tpu.memory_space<vmem>>, vector<384x128xf32>
    tpu.vector_store %arg3[%c0_3, %c0_4], %3 {strides = array<i32>} : memref<384x128xf32, #tpu.memory_space<vmem>>, vector<384x128xf32>,
    return
  }
  func.func @transform_0(%arg0: i32) -> (i32, i32) {
    %c0_i32 = arith.constant 0 : i32
    %c0_i32_0 = arith.constant 0 : i32
    return %arg0, %c0_i32 : i32, i32
  }
  func.func @transform_1(%arg0: i32) -> (i32, i32) {
    %c0_i32 = arith.constant 0 : i32
    %c0_i32_0 = arith.constant 0 : i32
    return %arg0, %c0_i32 : i32, i32
  }
  func.func @transform_2(%arg0: i32) -> (i32, i32) {
    %c0_i32 = arith.constant 0 : i32
    %c0_i32_0 = arith.constant 0 : i32
    return %arg0, %c0_i32 : i32, i32
  }
}

</mosaic_0001>

<bundles_post_ra>
// kernel: tpu_custom_call.1
= control target key start
LH: loop header
LB: loop body
LE: loop exit
PB: predicated region body
PF: predicated region fallthrough
CT: control target
= control target key end

     0   :  { %s726_s21 = smov 64   ;;  %s1036_s0 = inlined_call_operand.vmem [shape: f32[384,64], index: 0, kind: input, shape index: {}]   ;;  %s1037_s1 = inlined_call_operand.vmem [shape: bf16[5000,64], index: 1, kind: input, shape index: {}]   ;;  %s1038_s2 = inlined_call_operand.hbm [shape: f32[384,128], index: 2, kind: output, shape index: {}]  }
   0x1   :  { %v558_v0 = vld [vmem:[%s1037_s1 + $0x10] sm:$0xff]   ;;  %v462_v1 = vld [vmem:[%s1037_s1] sm:$0xff]   ;;  %v559_v2 = vld [vmem:[%s1037_s1 + $0x18] sm:$0xff]  }
   0x2   :  { %v471_v3 = vunpack.c.l.bf16 %v558_v0  ;;  %v472_v4 = vunpack.c.h.bf16 %v558_v0  ;;  %v463_v5 = vunpack.c.l.bf16 %v462_v1  ;;  %v464_v6 = vunpack.c.h.bf16 %v462_v1  ;;  %v557_v7 = vld [vmem:[%s1037_s1 + $0x8] sm:$0xff]   ;;  %v560_v13 = vld [vmem:[%s1037_s1 + $0x20] sm:$0xff]   ;;  %v563_v22 = vld [vmem:[%s1037_s1 + $0x38] sm:$0xff]  }
   0x3   :  { %v561_v8 = vld [vmem:[%s1037_s1 + $0x28] sm:$0xff]   ;;  %v475_v9 = vunpack.c.l.bf16 %v559_v2  ;;  %v476_v10 = vunpack.c.h.bf16 %v559_v2  ;;  %v467_v11 = vunpack.c.l.bf16 %v557_v7  ;;  %v468_v12 = vunpack.c.h.bf16 %v557_v7  ;;  %v562_v23 = vld [vmem:[%s1037_s1 + $0x30] sm:$0xff]   ;;  %v564_v31 = vld [vmem:[%s1037_s1 + $0x40] sm:$0xff]  }
   0x4   :  { %v594_v14 = vpack.i.bf16 %v472_v4, %v471_v3  ;;  %v584_v15 = vpack.i.bf16 %v464_v6, %v463_v5  ;;  %v483_v16 = vunpack.c.l.bf16 %v561_v8  ;;  %v484_v17 = vunpack.c.h.bf16 %v561_v8  ;;  %v565_v30 = vld [vmem:[%s1037_s1 + $0x48] sm:$0xff]   ;;  %v567_v38 = vld [vmem:[%s1037_s1 + $0x58] sm:$0xff]   ;;  %v566_v39 = vld [vmem:[%s1037_s1 + $0x50] sm:$0xff]  }
   0x5   :  { %v599_v18 = vpack.i.bf16 %v476_v10, %v475_v9  ;;  %v589_v19 = vpack.i.bf16 %v468_v12, %v467_v11  ;;  %v479_v20 = vunpack.c.l.bf16 %v560_v13  ;;  %v480_v21 = vunpack.c.h.bf16 %v560_v13  ;;  %v569_v46 = vld [vmem:[%s1037_s1 + $0x68] sm:$0xff]   ;;  %v568_v47 = vld [vmem:[%s1037_s1 + $0x60] sm:$0xff]  }
   0x6   :  { %595 = vrot.lane.b32.xlu1 %v594_v14, %s726_s21  ;;  %585 = vrot.lane.b32.xlu0 %v584_v15, %s726_s21  ;;  %v609_v24 = vpack.i.bf16 %v484_v17, %v483_v16  ;;  %v491_v25 = vunpack.c.l.bf16 %v563_v22  ;;  %v492_v27 = vunpack.c.h.bf16 %v563_v22  ;;  %v487_v28 = vunpack.c.l.bf16 %v562_v23 }
   0x7   :  { %v604_v26 = vpack.i.bf16 %v480_v21, %v479_v20  ;;  %v488_v29 = vunpack.c.h.bf16 %v562_v23  ;;  %v499_v32 = vunpack.c.l.bf16 %v565_v30  ;;  %v500_v33 = vunpack.c.h.bf16 %v565_v30 }
   0x8   :  { %v619_v34 = vpack.i.bf16 %v492_v27, %v491_v25  ;;  %v495_v36 = vunpack.c.l.bf16 %v564_v31  ;;  %v496_v37 = vunpack.c.h.bf16 %v564_v31  ;;  %v507_v41 = vunpack.c.l.bf16 %v567_v38 }
   0x9   :  { %v614_v35 = vpack.i.bf16 %v488_v29, %v487_v28  ;;  %v629_v40 = vpack.i.bf16 %v500_v33, %v499_v32  ;;  %v508_v43 = vunpack.c.h.bf16 %v567_v38  ;;  %v503_v44 = vunpack.c.l.bf16 %v566_v39 }
   0xa   :  { %600 = vrot.lane.b32.xlu1 %v599_v18, %s726_s21  ;;  %590 = vrot.lane.b32.xlu0 %v589_v19, %s726_s21  ;;  %v624_v42 = vpack.i.bf16 %v496_v37, %v495_v36  ;;  %v504_v45 = vunpack.c.h.bf16 %v566_v39 }
   0xe   :  { %610 = vrot.lane.b32.xlu1 %v609_v24, %s726_s21  ;;  %605 = vrot.lane.b32.xlu0 %v604_v26, %s726_s21 }
  0x12   :  { %620 = vrot.lane.b32.xlu1 %v619_v34, %s726_s21  ;;  %615 = vrot.lane.b32.xlu0 %v614_v35, %s726_s21 }
  0x13   :  { %7 = vsyncpa [#allocation3], 0  ;;  %v515_v48 = vunpack.c.l.bf16 %v569_v46  ;;  %v516_v49 = vunpack.c.h.bf16 %v569_v46  ;;  %v639_v50 = vpack.i.bf16 %v508_v43, %v507_v41  ;;  %v634_v51 = vpack.i.bf16 %v504_v45, %v503_v44  ;;  %v571_v54 = vld [vmem:[%s1037_s1 + $0x78] sm:$0xff]   ;;  %v570_v55 = vld [vmem:[%s1037_s1 + $0x70] sm:$0xff]   ;;  %s727_s3 = smov [#allocation2]  }
  0x14   :  { %v511_v52 = vunpack.c.l.bf16 %v568_v47  ;;  %v512_v53 = vunpack.c.h.bf16 %v568_v47  ;;  %v523_v57 = vunpack.c.l.bf16 %v571_v54  ;;  %v524_v59 = vunpack.c.h.bf16 %v571_v54  ;;  %v573_v62 = vld [vmem:[%s1037_s1 + $0x88] sm:$0xff]   ;;  %v572_v63 = vld [vmem:[%s1037_s1 + $0x80] sm:$0xff]   ;;  %v575_v6 = vld [vmem:[%s1037_s1 + $0x98] sm:$0xff]   ;;  %s450_s4 = sshll.u32 %s727_s3, 4  ;;  %s451_s4 = int_to_ptr.vmem [resolvable:$true] %s450_s4 }
  0x15   :  { %v649_v56 = vpack.i.bf16 %v516_v49, %v515_v48  ;;  %v519_v60 = vunpack.c.l.bf16 %v570_v55  ;;  %v520_v61 = vunpack.c.h.bf16 %v570_v55  ;;  %v531_v0 = vunpack.c.l.bf16 %v573_v62  ;;  %v574_v7 = vld [vmem:[%s1037_s1 + $0x90] sm:$0xff]   ;;  %v577_v14 = vld [vmem:[%s1037_s1 + $0xa8] sm:$0xff]   ;;  %v576_v15 = vld [vmem:[%s1037_s1 + $0xa0] sm:$0xff]   ;;  %s704_s12 = scalar_lea.vmem %s451_s4, 6144  ;;  %p709_p1 = scmp.lt.s32.totalorder %s451_s4, %s451_s4 }
  0x16   :  { %630 = vrot.lane.b32.xlu1 %v629_v40, %s726_s21  ;;  %625 = vrot.lane.b32.xlu0 %v624_v42, %s726_s21  ;;  %v644_v58 = vpack.i.bf16 %v512_v53, %v511_v52  ;;  %v532_v1 = vunpack.c.h.bf16 %v573_v62  ;;  %v659_v2 = vpack.i.bf16 %v524_v59, %v523_v57  ;;  %v527_v4 = vunpack.c.l.bf16 %v572_v63  ;;  %v579_v22 = vld [vmem:[%s1037_s1 + $0xb8] sm:$0xff]   ;;  %v578_v23 = vld [vmem:[%s1037_s1 + $0xb0] sm:$0xff]   ;;  %p705_p0 = scmp.ne.s32.totalorder %s451_s4, %s704_s12  ;;  %p710_p2 = scmp.lt.s32.totalorder %s704_s12, %s704_s12 }
  0x17   :  { %v654_v3 = vpack.i.bf16 %v520_v61, %v519_v60  ;;  %v528_v5 = vunpack.c.h.bf16 %v572_v63  ;;  %v539_v9 = vunpack.c.l.bf16 %v575_v6  ;;  %v540_v11 = vunpack.c.h.bf16 %v575_v6  ;;  %v16_v32 = vld [vmem:[%s1036_s0 + $0x20] sm:$0xff]  ;;  %v17_v34 = vld [vmem:[%s1036_s0 + $0x28] sm:$0xff]  ;;  %v18_v46 = vld [vmem:[%s1036_s0 + $0x30] sm:$0xff] }
  0x18   :  { %v669_v8 = vpack.i.bf16 %v532_v1, %v531_v0  ;;  %v535_v12 = vunpack.c.l.bf16 %v574_v7  ;;  %v536_v13 = vunpack.c.h.bf16 %v574_v7  ;;  %v547_v16 = vunpack.c.l.bf16 %v577_v14  ;;  %v12_v36 = vld [vmem:[%s1036_s0] sm:$0xff]  ;;  %v13_v37 = vld [vmem:[%s1036_s0 + $0x8] sm:$0xff]  ;;  %v19_v48 = vld [vmem:[%s1036_s0 + $0x38] sm:$0xff]  ;;  %p711_p3 = por %p710_p2, %p709_p1 }
  0x19   :  { %v664_v10 = vpack.i.bf16 %v528_v5, %v527_v4  ;;  %v548_v17 = vunpack.c.h.bf16 %v577_v14  ;;  %v679_v18 = vpack.i.bf16 %v540_v11, %v539_v9  ;;  %v543_v20 = vunpack.c.l.bf16 %v576_v15  ;;  %v22_v60 = vld [vmem:[%s1036_s0 + $0x50] sm:$0xff]  ;;  %v23_v62 = vld [vmem:[%s1036_s0 + $0x58] sm:$0xff]  ;;  %v20_v0 = vld [vmem:[%s1036_s0 + $0x40] sm:$0xff] }
  0x1a   :  { %640 = vrot.lane.b32.xlu1 %v639_v50, %s726_s21  ;;  %635 = vrot.lane.b32.xlu0 %v634_v51, %s726_s21  ;;  %v674_v19 = vpack.i.bf16 %v536_v13, %v535_v12  ;;  %v544_v21 = vunpack.c.h.bf16 %v576_v15  ;;  %v555_v25 = vunpack.c.l.bf16 %v579_v22  ;;  %v556_v27 = vunpack.c.h.bf16 %v579_v22  ;;  %v14_v50 = vld [vmem:[%s1036_s0 + $0x10] sm:$0xff]  ;;  %v15_v51 = vld [vmem:[%s1036_s0 + $0x18] sm:$0xff]  ;;  %p712_p4 = pnand %p711_p3, %p705_p0 }
  0x1b   :  { %v689_v24 = vpack.i.bf16 %v548_v17, %v547_v16  ;;  %v551_v28 = vunpack.c.l.bf16 %v578_v23  ;;  %v552_v29 = vunpack.c.h.bf16 %v578_v23  ;;  %vm348_vm0 = vcmask 523264   ;;  %v21_v1 = vld [vmem:[%s1036_s0 + $0x48] sm:$0xff]  ;;  %v27_v12 = vld [vmem:[%s1036_s0 + $0x78] sm:$0xff]  ;;  %v24_v14 = vld [vmem:[%s1036_s0 + $0x60] sm:$0xff] }
  0x1c   :  { %v684_v26 = vpack.i.bf16 %v544_v21, %v543_v20  ;;  %v699_v30 = vpack.i.bf16 %v556_v27, %v555_v25  ;;  %v25_v15 = vld [vmem:[%s1036_s0 + $0x68] sm:$0xff] }
  0x1d   :  { %v694_v31 = vpack.i.bf16 %v552_v29, %v551_v28  ;;  %v28_v28 = vld [vmem:[%s1036_s0 + $0x80] sm:$0xff]  ;;  %v29_v29 = vld [vmem:[%s1036_s0 + $0x88] sm:$0xff] }
  0x1e   :  { %650 = vrot.lane.b32.xlu1 %v649_v56, %s726_s21  ;;  %645 = vrot.lane.b32.xlu0 %v644_v58, %s726_s21 }
  0x22   :  { %660 = vrot.lane.b32.xlu1 %v659_v2, %s726_s21  ;;  %655 = vrot.lane.b32.xlu0 %v654_v3, %s726_s21 }
  0x26   :  { %670 = vrot.lane.b32.xlu1 %v669_v8, %s726_s21  ;;  %665 = vrot.lane.b32.xlu0 %v664_v10, %s726_s21  ;;  %v26_v10 = vld [vmem:[%s1036_s0 + $0x70] sm:$0xff] }
  0x2a   :  { %680 = vrot.lane.b32.xlu1 %v679_v18, %s726_s21  ;;  %675 = vrot.lane.b32.xlu0 %v674_v19, %s726_s21 }
  0x2e   :  { %690 = vrot.lane.b32.xlu1 %v689_v24, %s726_s21  ;;  %685 = vrot.lane.b32.xlu0 %v684_v26, %s726_s21  ;;  %v30_v24 = vld [vmem:[%s1036_s0 + $0x90] sm:$0xff]  ;;  %v31_v26 = vld [vmem:[%s1036_s0 + $0x98] sm:$0xff] }
  0x32   :  { %700 = vrot.lane.b32.xlu1 %v699_v30, %s726_s21  ;;  %695 = vrot.lane.b32.xlu0 %v694_v31, %s726_s21 }
  0x78   :  { %v596_v33 = vpop.permute.xlu1 %595  ;;  %v586_v35 = vpop.permute.xlu0 %585 }
  0x79   :  { %v598_v38 = vunpack.i.h.bf16 %v596_v33  ;;  %v597_v39 = vunpack.i.l.bf16 %v596_v33  ;;  %v588_v40 = vunpack.i.h.bf16 %v586_v35  ;;  %v587_v41 = vunpack.i.l.bf16 %v586_v35 }
  0x7b   :  { %v353_v42 = vsel %vm348_vm0, %v16_v32, %v597_v39  ;;  %v354_v43 = vsel %vm348_vm0, %v17_v34, %v598_v38  ;;  %v349_v44 = vsel %vm348_vm0, %v12_v36, %v587_v41  ;;  %v350_v45 = vsel %vm348_vm0, %v13_v37, %v588_v40  ;;  %v34_v38 = vld [vmem:[%s1036_s0 + $0xb0] sm:$0xff]  ;;  %v35_v40 = vld [vmem:[%s1036_s0 + $0xb8] sm:$0xff] }
  0x7c   :  { %401 = vst [vmem:[#allocation2 + $0x20] sm:$0xff] %v353_v42  ;;  %402 = vst [vmem:[#allocation2 + $0x28] sm:$0xff] %v354_v43  ;;  %v601_v47 = vpop.permute.xlu1 %600  ;;  %v591_v49 = vpop.permute.xlu0 %590  ;;  %v32_v42 = vld [vmem:[%s1036_s0 + $0xa0] sm:$0xff]  ;;  %v33_v43 = vld [vmem:[%s1036_s0 + $0xa8] sm:$0xff] }
  0x7d   :  { %397 = vst [vmem:[#allocation2] sm:$0xff] %v349_v44  ;;  %398 = vst [vmem:[#allocation2 + $0x8] sm:$0xff] %v350_v45  ;;  %v603_v52 = vunpack.i.h.bf16 %v601_v47  ;;  %v602_v53 = vunpack.i.l.bf16 %v601_v47  ;;  %v593_v54 = vunpack.i.h.bf16 %v591_v49  ;;  %v592_v55 = vunpack.i.l.bf16 %v591_v49 }
  0x7f   :  { %v355_v56 = vsel %vm348_vm0, %v18_v46, %v602_v53  ;;  %v356_v57 = vsel %vm348_vm0, %v19_v48, %v603_v52  ;;  %v351_v58 = vsel %vm348_vm0, %v14_v50, %v592_v55  ;;  %v352_v59 = vsel %vm348_vm0, %v15_v51, %v593_v54  ;;  %v38_v52 = vld [vmem:[%s1036_s0 + $0xd0] sm:$0xff]  ;;  %v39_v54 = vld [vmem:[%s1036_s0 + $0xd8] sm:$0xff] }
  0x80   :  { %403 = vst [vmem:[#allocation2 + $0x30] sm:$0xff] %v355_v56  ;;  %404 = vst [vmem:[#allocation2 + $0x38] sm:$0xff] %v356_v57  ;;  %v611_v61 = vpop.permute.xlu1 %610  ;;  %v606_v63 = vpop.permute.xlu0 %605  ;;  %v36_v56 = vld [vmem:[%s1036_s0 + $0xc0] sm:$0xff]  ;;  %v37_v57 = vld [vmem:[%s1036_s0 + $0xc8] sm:$0xff] }
  0x81   :  { %399 = vst [vmem:[#allocation2 + $0x10] sm:$0xff] %v351_v58  ;;  %400 = vst [vmem:[#allocation2 + $0x18] sm:$0xff] %v352_v59  ;;  %v613_v2 = vunpack.i.h.bf16 %v611_v61  ;;  %v612_v3 = vunpack.i.l.bf16 %v611_v61  ;;  %v608_v4 = vunpack.i.h.bf16 %v606_v63  ;;  %v607_v5 = vunpack.i.l.bf16 %v606_v63 }
  0x83   :  { %v359_v6 = vsel %vm348_vm0, %v22_v60, %v612_v3  ;;  %v360_v7 = vsel %vm348_vm0, %v23_v62, %v613_v2  ;;  %v357_v8 = vsel %vm348_vm0, %v20_v0, %v607_v5  ;;  %v358_v9 = vsel %vm348_vm0, %v21_v1, %v608_v4  ;;  %v42_v2 = vld [vmem:[%s1036_s0 + $0xf0] sm:$0xff]  ;;  %v43_v4 = vld [vmem:[%s1036_s0 + $0xf8] sm:$0xff] }
  0x84   :  { %407 = vst [vmem:[#allocation2 + $0x50] sm:$0xff] %v359_v6  ;;  %408 = vst [vmem:[#allocation2 + $0x58] sm:$0xff] %v360_v7  ;;  %v621_v11 = vpop.permute.xlu1 %620  ;;  %v616_v13 = vpop.permute.xlu0 %615  ;;  %v40_v6 = vld [vmem:[%s1036_s0 + $0xe0] sm:$0xff]  ;;  %v41_v7 = vld [vmem:[%s1036_s0 + $0xe8] sm:$0xff] }
  0x85   :  { %405 = vst [vmem:[#allocation2 + $0x40] sm:$0xff] %v357_v8  ;;  %406 = vst [vmem:[#allocation2 + $0x48] sm:$0xff] %v358_v9  ;;  %v623_v16 = vunpack.i.h.bf16 %v621_v11  ;;  %v622_v17 = vunpack.i.l.bf16 %v621_v11  ;;  %v618_v18 = vunpack.i.h.bf16 %v616_v13  ;;  %v617_v19 = vunpack.i.l.bf16 %v616_v13 }
  0x87   :  { %v363_v20 = vsel %vm348_vm0, %v26_v10, %v622_v17  ;;  %v364_v21 = vsel %vm348_vm0, %v27_v12, %v623_v16  ;;  %v361_v22 = vsel %vm348_vm0, %v24_v14, %v617_v19  ;;  %v362_v23 = vsel %vm348_vm0, %v25_v15, %v618_v18  ;;  %v46_v16 = vld [vmem:[%s1036_s0 + $0x110] sm:$0xff]  ;;  %v47_v18 = vld [vmem:[%s1036_s0 + $0x118] sm:$0xff] }
  0x88   :  { %411 = vst [vmem:[#allocation2 + $0x70] sm:$0xff] %v363_v20  ;;  %412 = vst [vmem:[#allocation2 + $0x78] sm:$0xff] %v364_v21  ;;  %v631_v25 = vpop.permute.xlu1 %630  ;;  %v626_v27 = vpop.permute.xlu0 %625  ;;  %v44_v20 = vld [vmem:[%s1036_s0 + $0x100] sm:$0xff]  ;;  %v45_v21 = vld [vmem:[%s1036_s0 + $0x108] sm:$0xff] }
  0x89   :  { %409 = vst [vmem:[#allocation2 + $0x60] sm:$0xff] %v361_v22  ;;  %410 = vst [vmem:[#allocation2 + $0x68] sm:$0xff] %v362_v23  ;;  %v633_v30 = vunpack.i.h.bf16 %v631_v25  ;;  %v632_v31 = vunpack.i.l.bf16 %v631_v25  ;;  %v628_v32 = vunpack.i.h.bf16 %v626_v27  ;;  %v627_v33 = vunpack.i.l.bf16 %v626_v27 }
  0x8b   :  { %v367_v34 = vsel %vm348_vm0, %v30_v24, %v632_v31  ;;  %v368_v35 = vsel %vm348_vm0, %v31_v26, %v633_v30  ;;  %v365_v36 = vsel %vm348_vm0, %v28_v28, %v627_v33  ;;  %v366_v37 = vsel %vm348_vm0, %v29_v29, %v628_v32  ;;  %v50_v30 = vld [vmem:[%s1036_s0 + $0x130] sm:$0xff]  ;;  %v51_v32 = vld [vmem:[%s1036_s0 + $0x138] sm:$0xff] }
  0x8c   :  { %415 = vst [vmem:[#allocation2 + $0x90] sm:$0xff] %v367_v34  ;;  %416 = vst [vmem:[#allocation2 + $0x98] sm:$0xff] %v368_v35  ;;  %v641_v39 = vpop.permute.xlu1 %640  ;;  %v636_v41 = vpop.permute.xlu0 %635  ;;  %v48_v34 = vld [vmem:[%s1036_s0 + $0x120] sm:$0xff]  ;;  %v49_v35 = vld [vmem:[%s1036_s0 + $0x128] sm:$0xff] }
  0x8d   :  { %413 = vst [vmem:[#allocation2 + $0x80] sm:$0xff] %v365_v36  ;;  %414 = vst [vmem:[#allocation2 + $0x88] sm:$0xff] %v366_v37  ;;  %v643_v44 = vunpack.i.h.bf16 %v641_v39  ;;  %v642_v45 = vunpack.i.l.bf16 %v641_v39  ;;  %v638_v46 = vunpack.i.h.bf16 %v636_v41  ;;  %v637_v47 = vunpack.i.l.bf16 %v636_v41 }
  0x8f   :  { %v371_v48 = vsel %vm348_vm0, %v34_v38, %v642_v45  ;;  %v372_v49 = vsel %vm348_vm0, %v35_v40, %v643_v44  ;;  %v369_v50 = vsel %vm348_vm0, %v32_v42, %v637_v47  ;;  %v370_v51 = vsel %vm348_vm0, %v33_v43, %v638_v46  ;;  %v54_v44 = vld [vmem:[%s1036_s0 + $0x150] sm:$0xff]  ;;  %v55_v46 = vld [vmem:[%s1036_s0 + $0x158] sm:$0xff] }
  0x90   :  { %419 = vst [vmem:[#allocation2 + $0xb0] sm:$0xff] %v371_v48  ;;  %420 = vst [vmem:[#allocation2 + $0xb8] sm:$0xff] %v372_v49  ;;  %v651_v53 = vpop.permute.xlu1 %650  ;;  %v646_v55 = vpop.permute.xlu0 %645  ;;  %v52_v48 = vld [vmem:[%s1036_s0 + $0x140] sm:$0xff]  ;;  %v53_v49 = vld [vmem:[%s1036_s0 + $0x148] sm:$0xff] }
  0x91   :  { %417 = vst [vmem:[#allocation2 + $0xa0] sm:$0xff] %v369_v50  ;;  %418 = vst [vmem:[#allocation2 + $0xa8] sm:$0xff] %v370_v51  ;;  %v653_v58 = vunpack.i.h.bf16 %v651_v53  ;;  %v652_v59 = vunpack.i.l.bf16 %v651_v53  ;;  %v648_v60 = vunpack.i.h.bf16 %v646_v55  ;;  %v647_v61 = vunpack.i.l.bf16 %v646_v55 }
  0x93   :  { %v375_v62 = vsel %vm348_vm0, %v38_v52, %v652_v59  ;;  %v376_v63 = vsel %vm348_vm0, %v39_v54, %v653_v58  ;;  %v373_v0 = vsel %vm348_vm0, %v36_v56, %v647_v61  ;;  %v374_v1 = vsel %vm348_vm0, %v37_v57, %v648_v60  ;;  %v58_v58 = vld [vmem:[%s1036_s0 + $0x170] sm:$0xff]  ;;  %v59_v60 = vld [vmem:[%s1036_s0 + $0x178] sm:$0xff] }
  0x94   :  { %423 = vst [vmem:[#allocation2 + $0xd0] sm:$0xff] %v375_v62  ;;  %424 = vst [vmem:[#allocation2 + $0xd8] sm:$0xff] %v376_v63  ;;  %v661_v3 = vpop.permute.xlu1 %660  ;;  %v656_v5 = vpop.permute.xlu0 %655  ;;  %v56_v62 = vld [vmem:[%s1036_s0 + $0x160] sm:$0xff]  ;;  %v57_v63 = vld [vmem:[%s1036_s0 + $0x168] sm:$0xff] }
  0x95   :  { %421 = vst [vmem:[#allocation2 + $0xc0] sm:$0xff] %v373_v0  ;;  %422 = vst [vmem:[#allocation2 + $0xc8] sm:$0xff] %v374_v1  ;;  %v663_v8 = vunpack.i.h.bf16 %v661_v3  ;;  %v662_v9 = vunpack.i.l.bf16 %v661_v3  ;;  %v658_v10 = vunpack.i.h.bf16 %v656_v5  ;;  %v657_v11 = vunpack.i.l.bf16 %v656_v5 }
  0x97   :  { %v379_v12 = vsel %vm348_vm0, %v42_v2, %v662_v9  ;;  %v380_v13 = vsel %vm348_vm0, %v43_v4, %v663_v8  ;;  %v377_v14 = vsel %vm348_vm0, %v40_v6, %v657_v11  ;;  %v378_v15 = vsel %vm348_vm0, %v41_v7, %v658_v10 }
  0x98   :  { %427 = vst [vmem:[#allocation2 + $0xf0] sm:$0xff] %v379_v12  ;;  %428 = vst [vmem:[#allocation2 + $0xf8] sm:$0xff] %v380_v13  ;;  %v671_v17 = vpop.permute.xlu1 %670  ;;  %v666_v19 = vpop.permute.xlu0 %665 }
  0x99   :  { %425 = vst [vmem:[#allocation2 + $0xe0] sm:$0xff] %v377_v14  ;;  %426 = vst [vmem:[#allocation2 + $0xe8] sm:$0xff] %v378_v15  ;;  %v673_v22 = vunpack.i.h.bf16 %v671_v17  ;;  %v672_v23 = vunpack.i.l.bf16 %v671_v17  ;;  %v668_v24 = vunpack.i.h.bf16 %v666_v19  ;;  %v667_v25 = vunpack.i.l.bf16 %v666_v19 }
  0x9b   :  { %v383_v26 = vsel %vm348_vm0, %v46_v16, %v672_v23  ;;  %v384_v27 = vsel %vm348_vm0, %v47_v18, %v673_v22  ;;  %v381_v28 = vsel %vm348_vm0, %v44_v20, %v667_v25  ;;  %v382_v29 = vsel %vm348_vm0, %v45_v21, %v668_v24 }
  0x9c   :  { %431 = vst [vmem:[#allocation2 + $0x110] sm:$0xff] %v383_v26  ;;  %432 = vst [vmem:[#allocation2 + $0x118] sm:$0xff] %v384_v27  ;;  %v681_v31 = vpop.permute.xlu1 %680  ;;  %v676_v33 = vpop.permute.xlu0 %675 }
  0x9d   :  { %429 = vst [vmem:[#allocation2 + $0x100] sm:$0xff] %v381_v28  ;;  %430 = vst [vmem:[#allocation2 + $0x108] sm:$0xff] %v382_v29  ;;  %v683_v36 = vunpack.i.h.bf16 %v681_v31  ;;  %v682_v37 = vunpack.i.l.bf16 %v681_v31  ;;  %v678_v38 = vunpack.i.h.bf16 %v676_v33  ;;  %v677_v39 = vunpack.i.l.bf16 %v676_v33 }
  0x9f   :  { %v387_v40 = vsel %vm348_vm0, %v50_v30, %v682_v37  ;;  %v388_v41 = vsel %vm348_vm0, %v51_v32, %v683_v36  ;;  %v385_v42 = vsel %vm348_vm0, %v48_v34, %v677_v39  ;;  %v386_v43 = vsel %vm348_vm0, %v49_v35, %v678_v38 }
  0xa0   :  { %435 = vst [vmem:[#allocation2 + $0x130] sm:$0xff] %v387_v40  ;;  %436 = vst [vmem:[#allocation2 + $0x138] sm:$0xff] %v388_v41  ;;  %v691_v45 = vpop.permute.xlu1 %690  ;;  %v686_v47 = vpop.permute.xlu0 %685 }
  0xa1   :  { %433 = vst [vmem:[#allocation2 + $0x120] sm:$0xff] %v385_v42  ;;  %434 = vst [vmem:[#allocation2 + $0x128] sm:$0xff] %v386_v43  ;;  %v693_v50 = vunpack.i.h.bf16 %v691_v45  ;;  %v692_v51 = vunpack.i.l.bf16 %v691_v45  ;;  %v688_v52 = vunpack.i.h.bf16 %v686_v47  ;;  %v687_v53 = vunpack.i.l.bf16 %v686_v47 }
  0xa3   :  { %v391_v54 = vsel %vm348_vm0, %v54_v44, %v692_v51  ;;  %v392_v55 = vsel %vm348_vm0, %v55_v46, %v693_v50  ;;  %v389_v56 = vsel %vm348_vm0, %v52_v48, %v687_v53  ;;  %v390_v57 = vsel %vm348_vm0, %v53_v49, %v688_v52 }
  0xa4   :  { %439 = vst [vmem:[#allocation2 + $0x150] sm:$0xff] %v391_v54  ;;  %440 = vst [vmem:[#allocation2 + $0x158] sm:$0xff] %v392_v55  ;;  %v701_v59 = vpop.permute.xlu1 %700  ;;  %v696_v61 = vpop.permute.xlu0 %695 }
  0xa5   :  { %437 = vst [vmem:[#allocation2 + $0x140] sm:$0xff] %v389_v56  ;;  %438 = vst [vmem:[#allocation2 + $0x148] sm:$0xff] %v390_v57  ;;  %v703_v0 = vunpack.i.h.bf16 %v701_v59  ;;  %v702_v1 = vunpack.i.l.bf16 %v701_v59  ;;  %v698_v2 = vunpack.i.h.bf16 %v696_v61  ;;  %v697_v3 = vunpack.i.l.bf16 %v696_v61 }
  0xa7   :  { %v395_v4 = vsel %vm348_vm0, %v58_v58, %v702_v1  ;;  %v396_v5 = vsel %vm348_vm0, %v59_v60, %v703_v0  ;;  %v393_v6 = vsel %vm348_vm0, %v56_v62, %v697_v3  ;;  %v394_v7 = vsel %vm348_vm0, %v57_v63, %v698_v2 }
  0xa8   :  { %443 = vst [vmem:[#allocation2 + $0x170] sm:$0xff] %v395_v4  ;;  %444 = vst [vmem:[#allocation2 + $0x178] sm:$0xff] %v396_v5 }
  0xa9   :  { %441 = vst [vmem:[#allocation2 + $0x160] sm:$0xff] %v393_v6  ;;  %442 = vst [vmem:[#allocation2 + $0x168] sm:$0xff] %v394_v7 }
  0xaa   :  { %715 = shalt.err (!%p712_p4)
}
  0xab   :  { %s728_s0 = smov 128   ;;  %s729_s13 = smov 8  }
  0xac   :  { %456 = dma.vmem_to_hbm [thread:$0]  %s451_s4, 6144, %s1038_s2, [#allocation3], %s728_s0, %s728_s0, %s729_s13  }
  0xad   :  { %724 = dma.done.wait [#allocation3], 6144  }
  0xae   :  { %725 = vsyncadd [#allocation3], 4294961152 }
  0xaf   :  { %460 = vsyncpa [#allocation3], 1 }

</bundles_post_ra>
